<compile_context>
chip_gen: v7x
topology: tpu7x:2x2x1
jax: 0.10.0
libtpu: 0.0.40
codegen_flags: <defaults>
</compile_context>

<pallas_src>
import functools

import jax
import jax.numpy as jnp
from jax.experimental import pallas as pl
from jax.experimental.pallas import tpu as pltpu


def _round_up(x, m):
    return (x + m - 1) // m * m


# --------------------------------------------------------------------------
# Fused Pallas kernel: conv(all windows) + bias + ReLU + max-pool + FC
# --------------------------------------------------------------------------
def _fused_cnn_text_kernel(max_window, t_all,
                           emb_ref, wconv_ref, bconv_ref, limit_ref,
                           wfc_ref, bfc_ref, out_ref):
    """Per batch tile.

    emb_ref   : (TB, Tpad, E)        bf16, Tpad = t_all + max_window - 1
    wconv_ref : (max_window*E, NFp)  bf16, packed filters of all window sizes
    bconv_ref : (1, NFp)             f32,  packed conv biases
    limit_ref : (1, NFp)             i32,  valid time length per output column
    wfc_ref   : (NFp, Cp)            bf16, padded FC weight
    bfc_ref   : (1, Cp)              f32,  padded FC bias
    out_ref   : (TB, Cp)             f32
    """
    TB, _, E = emb_ref.shape
    nf_pad = wconv_ref.shape[-1]

    # im2col matmul decomposed over the (tiny, statically unrolled) window
    # taps.  Each tap is ONE 2-D MXU matmul with M = TB*t_all, N = nf_pad:
    #   acc[b*t_all + t, :] += emb[b, t + dt, :] @ Wpack[dt*E:(dt+1)*E, :]
    x0 = emb_ref[:, 0:t_all, :].reshape(TB * t_all, E)
    acc = jnp.dot(x0, wconv_ref[0:E, :], preferred_element_type=jnp.float32)
    for dt in range(1, max_window):
        x_dt = emb_ref[:, dt:dt + t_all, :].reshape(TB * t_all, E)
        acc = acc + jnp.dot(x_dt, wconv_ref[dt * E:(dt + 1) * E, :],
                            preferred_element_type=jnp.float32)

    act = jnp.maximum(acc + bconv_ref[...], 0.0)          # bias + ReLU (f32)
    act = act.reshape(TB, t_all, nf_pad)

    # Mask rows beyond each window's valid PyTorch output length (S + w - 1).
    # ReLU outputs are >= 0 and the valid set is non-empty, so masking the
    # invalid rows to 0 never changes the max.
    t_idx = jax.lax.broadcasted_iota(jnp.int32, (TB, t_all, nf_pad), 1)
    act = jnp.where(t_idx < limit_ref[...][None, :, :], act, 0.0)
    pooled = jnp.max(act, axis=1)                          # (TB, nf_pad) f32

    # TODO(synk): nn.Dropout is identity at inference; no stochastic mask.
    out_ref[...] = (
        jnp.dot(pooled.astype(wfc_ref.dtype), wfc_ref[...],
                preferred_element_type=jnp.float32)
        + bfc_ref[...]
    )


# --------------------------------------------------------------------------
# Parameter init / packing
# --------------------------------------------------------------------------
def init_params(key, vocab_size, embedding_dim, class_num, num_filters, window_sizes):
    n_keys = 2 * len(window_sizes) + 4
    keys = jax.random.split(key, n_keys)
    params = {
        "embedding": 0.1 * jax.random.normal(
            keys[0], (vocab_size, embedding_dim), jnp.float32),
        "conv_w": [],
        "conv_b": [],
    }
    for i, w in enumerate(window_sizes):
        params["conv_w"].append(
            0.1 * jax.random.normal(
                keys[1 + 2 * i], (w, embedding_dim, num_filters), jnp.float32))
        params["conv_b"].append(
            0.1 * jax.random.normal(keys[2 + 2 * i], (1, num_filters), jnp.float32))
    d_in = num_filters * len(window_sizes)
    params["fc_w"] = 0.1 * jax.random.normal(keys[-2], (d_in, class_num), jnp.float32)
    params["fc_b"] = 0.1 * jax.random.normal(keys[-1], (1, class_num), jnp.float32)
    return params


def _pack_params(params, window_sizes, seq_len, compute_dtype):
    """Pack all window sizes' filters into one lane-dense weight."""
    E = params["embedding"].shape[1]
    F = params["conv_w"][0].shape[-1]
    C = params["fc_w"].shape[-1]
    max_w = max(window_sizes)
    NF = F * len(window_sizes)
    NF_pad = _round_up(NF, 128)
    C_pad = _round_up(C, 128)

    wpack = jnp.zeros((max_w * E, NF_pad), jnp.float32)
    bpack = jnp.zeros((1, NF_pad), jnp.float32)
    limit = jnp.zeros((1, NF_pad), jnp.int32)
    for j, w in enumerate(window_sizes):
        off = max_w - w                       # K-offset so one slab serves all windows
        cw = params["conv_w"][j]              # (w, E, F)
        wpack = wpack.at[off * E:(off + w) * E, j * F:(j + 1) * F].set(
            cw.reshape(w * E, F))
        bpack = bpack.at[:, j * F:(j + 1) * F].set(params["conv_b"][j])
        limit = limit.at[:, j * F:(j + 1) * F].set(seq_len + w - 1)

    wfc = jnp.zeros((NF_pad, C_pad), jnp.float32)
    wfc = wfc.at[:NF, :C].set(params["fc_w"])
    bfc = jnp.zeros((1, C_pad), jnp.float32).at[:, :C].set(params["fc_b"])

    return (wpack.astype(compute_dtype), bpack, limit,
            wfc.astype(compute_dtype), bfc, NF_pad, C_pad, max_w)


# --------------------------------------------------------------------------
# Forward
# --------------------------------------------------------------------------
def cnn_text_forward(params, tokens, window_sizes, *, batch_tile=64,
                     compute_dtype=jnp.bfloat16):
    B, S = tokens.shape
    E = params["embedding"].shape[1]
    C = params["fc_w"].shape[-1]

    (wpack, bpack, limit, wfc, bfc, NF_pad, C_pad, max_w) = _pack_params(
        params, window_sizes, S, compute_dtype)

    # Pad ONCE (max window), aligned so in-kernel reshapes are layout-clean.
    t_all = _round_up(S + max_w - 1, 16)       # per-example rows fed to max-pool
    Tpad = t_all + max_w - 1
    left_pad = max_w - 1
    right_pad = Tpad - left_pad - S            # >= max_w - 1 (PyTorch right pad)

    emb = jnp.take(params["embedding"], tokens, axis=0)          # (B, S, E)
    emb = jnp.pad(emb, ((0, 0), (left_pad, right_pad), (0, 0)))
    emb = emb.astype(compute_dtype)

    TB = min(batch_tile, B)
    B_pad = _round_up(B, TB)
    if B_pad != B:
        emb = jnp.pad(emb, ((0, B_pad - B), (0, 0), (0, 0)))

    kern = functools.partial(_fused_cnn_text_kernel, max_w, t_all)
    out = pl.pallas_call(
        kern,
        out_shape=jax.ShapeDtypeStruct((B_pad, C_pad), jnp.float32),
        grid_spec=pltpu.PrefetchScalarGridSpec(
            num_scalar_prefetch=0,
            grid=(B_pad // TB,),
            in_specs=[
                pl.BlockSpec((TB, Tpad, E), lambda b: (b, 0, 0)),      # embeddings
                pl.BlockSpec((max_w * E, NF_pad), lambda b: (0, 0)),   # packed conv W
                pl.BlockSpec((1, NF_pad), lambda b: (0, 0)),           # packed conv b
                pl.BlockSpec((1, NF_pad), lambda b: (0, 0)),           # valid lengths
                pl.BlockSpec((NF_pad, C_pad), lambda b: (0, 0)),       # fc W (padded)
                pl.BlockSpec((1, C_pad), lambda b: (0, 0)),            # fc b (padded)
            ],
            out_specs=pl.BlockSpec((TB, C_pad), lambda b: (b, 0)),
        ),
        compiler_params=pltpu.CompilerParams(
            dimension_semantics=("parallel",),
            vmem_limit_bytes=32 * 1024 * 1024,
        ),
    )(emb, wpack, bpack, limit, wfc, bfc)

    return out[:B, :C]


# --------------------------------------------------------------------------
# Pure-JAX reference (f32, PyTorch-equivalent math)
# --------------------------------------------------------------------------
def reference_forward(params, tokens, window_sizes):
    emb = jnp.take(params["embedding"], tokens, axis=0)
    outs = []
    for i, w in enumerate(window_sizes):
        pad = w - 1
        ep = jnp.pad(emb, ((0, 0), (pad, pad), (0, 0)))
        Tout = ep.shape[1] - w + 1
        acc = jnp.zeros((emb.shape[0], Tout, params["conv_w"][i].shape[-1]),
                        jnp.float32)
        for dt in range(w):
            acc = acc + jnp.einsum("bte,ef->btf", ep[:, dt:dt + Tout, :],
                                   params["conv_w"][i][dt])
        acc = acc + params["conv_b"][i]
        outs.append(jnp.max(jnp.maximum(acc, 0.0), axis=1))
    all_out = jnp.concatenate(outs, axis=1)
    return all_out @ params["fc_w"] + params["fc_b"]


if __name__ == "__main__":
    # Small, module-consistent shapes.
    vocab_size = 50
    embedding_dim = 32
    class_num = 4
    num_filters = 8
    window_sizes = [2, 3]
    batch_size = 2
    num_sequences = 8  # sequence length

    key = jax.random.PRNGKey(0)
    k_tok, k_param = jax.random.split(key)

    tokens = jax.random.randint(
        k_tok, (batch_size, num_sequences), 0, vocab_size, dtype=jnp.int32)
    params = init_params(
        k_param, vocab_size, embedding_dim, class_num, num_filters, window_sizes)

    fwd = jax.jit(functools.partial(cnn_text_forward,
                                    window_sizes=tuple(window_sizes)))
    logits = jax.block_until_ready(fwd(params, tokens))

    ref = jax.block_until_ready(reference_forward(params, tokens, window_sizes))
    assert logits.shape == (batch_size, class_num)
    # bf16 matmul operands (f32 accumulation) -> loosened tolerance vs f32 ref.
    assert jnp.allclose(logits, ref, atol=2e-2, rtol=2e-2), (
        jnp.max(jnp.abs(logits - ref)))

    print("KERNEL_OK")
</pallas_src>

<mosaic_0001>
module attributes {stable_mosaic.version = 11 : i64} {
  func.func @_fused_cnn_text_kernel(%arg0: i32, %arg1: memref<2x18x32xbf16, #tpu.memory_space<vmem>>, %arg2: memref<96x128xbf16, #tpu.memory_space<vmem>>, %arg3: memref<1x128xf32, #tpu.memory_space<vmem>>, %arg4: memref<1x128xi32, #tpu.memory_space<vmem>>, %arg5: memref<128x128xbf16, #tpu.memory_space<vmem>>, %arg6: memref<1x128xf32, #tpu.memory_space<vmem>>, %arg7: memref<2x128xf32, #tpu.memory_space<vmem>>) attributes {dimension_semantics = [#tpu.dimension_semantics<parallel>], iteration_bounds = array<i64: 1>, scalar_prefetch = 0 : i64, scratch_operands = 0 : i64, tpu.core_type = #tpu.core_type<tc>, window_params = [{transform_indices = @transform_0, window_bounds = array<i64: 2, 18, 32>}, {pipeline_mode = #tpu.pipeline_mode<synchronous>, transform_indices = @transform_1, window_bounds = array<i64: 96, 128>}, {pipeline_mode = #tpu.pipeline_mode<synchronous>, transform_indices = @transform_2, window_bounds = array<i64: 1, 128>}, {pipeline_mode = #tpu.pipeline_mode<synchronous>, transform_indices = @transform_3, window_bounds = array<i64: 1, 128>}, {pipeline_mode = #tpu.pipeline_mode<synchronous>, transform_indices = @transform_4, window_bounds = array<i64: 128, 128>}, {pipeline_mode = #tpu.pipeline_mode<synchronous>, transform_indices = @transform_5, window_bounds = array<i64: 1, 128>}, {transform_indices = @transform_6, window_bounds = array<i64: 2, 128>}]} {
    %c0 = arith.constant 0 : index
    %c0_0 = arith.constant 0 : index
    %c0_1 = arith.constant 0 : index
    %0 = vector.load %arg1[%c0, %c0_0, %c0_1] : memref<2x18x32xbf16, #tpu.memory_space<vmem>>, vector<2x16x32xbf16>
    %1 = vector.shape_cast %0 : vector<2x16x32xbf16> to vector<32x32xbf16>
    %c0_2 = arith.constant 0 : index
    %c0_3 = arith.constant 0 : index
    %2 = vector.load %arg2[%c0_2, %c0_3] : memref<96x128xbf16, #tpu.memory_space<vmem>>, vector<32x128xbf16>
    %cst = arith.constant dense<0.000000e+00> : vector<32x128xf32>
    %3 = tpu.matmul %1, %2, %cst {dimension_numbers = #tpu.dot_dimension_numbers<[1], [0], [0], [1], [0, 0, 1, 1], [], []>} : vector<32x32xbf16>, vector<32x128xbf16>, vector<32x128xf32> -> vector<32x128xf32>
    %c0_4 = arith.constant 0 : index
    %c1 = arith.constant 1 : index
    %c0_5 = arith.constant 0 : index
    %4 = vector.load %arg1[%c0_4, %c1, %c0_5] : memref<2x18x32xbf16, #tpu.memory_space<vmem>>, vector<2x16x32xbf16>
    %5 = vector.shape_cast %4 : vector<2x16x32xbf16> to vector<32x32xbf16>
    %c32 = arith.constant 32 : index
    %c0_6 = arith.constant 0 : index
    %6 = vector.load %arg2[%c32, %c0_6] : memref<96x128xbf16, #tpu.memory_space<vmem>>, vector<32x128xbf16>
    %cst_7 = arith.constant dense<0.000000e+00> : vector<32x128xf32>
    %7 = tpu.matmul %5, %6, %cst_7 {dimension_numbers = #tpu.dot_dimension_numbers<[1], [0], [0], [1], [0, 0, 1, 1], [], []>} : vector<32x32xbf16>, vector<32x128xbf16>, vector<32x128xf32> -> vector<32x128xf32>
    %8 = arith.addf %3, %7 : vector<32x128xf32>
    %c0_8 = arith.constant 0 : index
    %c2 = arith.constant 2 : index
    %c0_9 = arith.constant 0 : index
    %9 = vector.load %arg1[%c0_8, %c2, %c0_9] : memref<2x18x32xbf16, #tpu.memory_space<vmem>>, vector<2x16x32xbf16>
    %10 = vector.shape_cast %9 : vector<2x16x32xbf16> to vector<32x32xbf16>
    %c64 = arith.constant 64 : index
    %c0_10 = arith.constant 0 : index
    %11 = vector.load %arg2[%c64, %c0_10] : memref<96x128xbf16, #tpu.memory_space<vmem>>, vector<32x128xbf16>
    %cst_11 = arith.constant dense<0.000000e+00> : vector<32x128xf32>
    %12 = tpu.matmul %10, %11, %cst_11 {dimension_numbers = #tpu.dot_dimension_numbers<[1], [0], [0], [1], [0, 0, 1, 1], [], []>} : vector<32x32xbf16>, vector<32x128xbf16>, vector<32x128xf32> -> vector<32x128xf32>
    %13 = arith.addf %8, %12 : vector<32x128xf32>
    %c0_12 = arith.constant 0 : index
    %c0_13 = arith.constant 0 : index
    %14 = vector.load %arg3[%c0_12, %c0_13] : memref<1x128xf32, #tpu.memory_space<vmem>>, vector<1x128xf32>
    %15 = vector.broadcast %14 : vector<1x128xf32> to vector<32x128xf32>
    %16 = arith.addf %13, %15 : vector<32x128xf32>
    %cst_14 = arith.constant 0.000000e+00 : f32
    %17 = vector.broadcast %cst_14 : f32 to vector<32x128xf32>
    %18 = arith.maximumf %16, %17 : vector<32x128xf32>
    %19 = vector.shape_cast %18 : vector<32x128xf32> to vector<2x16x128xf32>
    %20 = tpu.iota {dimensions = array<i32: 1>} : vector<2x16x128xi32>
    %c0_15 = arith.constant 0 : index
    %c0_16 = arith.constant 0 : index
    %21 = vector.load %arg4[%c0_15, %c0_16] : memref<1x128xi32, #tpu.memory_space<vmem>>, vector<1x128xi32>
    %22 = vector.shape_cast %21 : vector<1x128xi32> to vector<1x1x128xi32>
    %23 = vector.broadcast %22 : vector<1x1x128xi32> to vector<2x16x128xi32>
    %24 = arith.cmpi slt, %20, %23 : vector<2x16x128xi32>
    %cst_17 = arith.constant 0.000000e+00 : f32
    %25 = vector.broadcast %cst_17 : f32 to vector<2x16x128xf32>
    %26 = arith.select %24, %19, %25 : vector<2x16x128xi1>, vector<2x16x128xf32>
    %cst_18 = arith.constant dense<0xFF800000> : vector<2x128xf32>
    %27 = vector.multi_reduction <maximumf>, %26, %cst_18 [1] : vector<2x16x128xf32> to vector<2x128xf32>
    %28 = arith.truncf %27 : vector<2x128xf32> to vector<2x128xbf16>
    %c0_19 = arith.constant 0 : index
    %c0_20 = arith.constant 0 : index
    %29 = vector.load %arg5[%c0_19, %c0_20] : memref<128x128xbf16, #tpu.memory_space<vmem>>, vector<128x128xbf16>
    %cst_21 = arith.constant dense<0.000000e+00> : vector<2x128xf32>
    %30 = tpu.matmul %28, %29, %cst_21 {dimension_numbers = #tpu.dot_dimension_numbers<[1], [0], [0], [1], [0, 0, 1, 1], [], []>} : vector<2x128xbf16>, vector<128x128xbf16>, vector<2x128xf32> -> vector<2x128xf32>
    %c0_22 = arith.constant 0 : index
    %c0_23 = arith.constant 0 : index
    %31 = vector.load %arg6[%c0_22, %c0_23] : memref<1x128xf32, #tpu.memory_space<vmem>>, vector<1x128xf32>
    %32 = vector.broadcast %31 : vector<1x128xf32> to vector<2x128xf32>
    %33 = arith.addf %30, %32 : vector<2x128xf32>
    %c0_24 = arith.constant 0 : index
    %c0_25 = arith.constant 0 : index
    %34 = vector.load %arg7[%c0_24, %c0_25] : memref<2x128xf32, #tpu.memory_space<vmem>>, vector<2x128xf32>
    tpu.vector_store %arg7[%c0_24, %c0_25], %33 {strides = array<i32>} : memref<2x128xf32, #tpu.memory_space<vmem>>, vector<2x128xf32>,
    return
  }
  func.func @transform_0(%arg0: i32) -> (i32, i32, i32) {
    %c0_i32 = arith.constant 0 : i32
    %c0_i32_0 = arith.constant 0 : i32
    %c0_i32_1 = arith.constant 0 : i32
    return %arg0, %c0_i32, %c0_i32_0 : i32, i32, i32
  }
  func.func @transform_1(%arg0: i32) -> (i32, i32) {
    %c0_i32 = arith.constant 0 : i32
    %c0_i32_0 = arith.constant 0 : i32
    %c0_i32_1 = arith.constant 0 : i32
    return %c0_i32, %c0_i32_0 : i32, i32
  }
  func.func @transform_2(%arg0: i32) -> (i32, i32) {
    %c0_i32 = arith.constant 0 : i32
    %c0_i32_0 = arith.constant 0 : i32
    %c0_i32_1 = arith.constant 0 : i32
    return %c0_i32, %c0_i32_0 : i32, i32
  }
  func.func @transform_3(%arg0: i32) -> (i32, i32) {
    %c0_i32 = arith.constant 0 : i32
    %c0_i32_0 = arith.constant 0 : i32
    %c0_i32_1 = arith.constant 0 : i32
    return %c0_i32, %c0_i32_0 : i32, i32
  }
  func.func @transform_4(%arg0: i32) -> (i32, i32) {
    %c0_i32 = arith.constant 0 : i32
    %c0_i32_0 = arith.constant 0 : i32
    %c0_i32_1 = arith.constant 0 : i32
    return %c0_i32, %c0_i32_0 : i32, i32
  }
  func.func @transform_5(%arg0: i32) -> (i32, i32) {
    %c0_i32 = arith.constant 0 : i32
    %c0_i32_0 = arith.constant 0 : i32
    %c0_i32_1 = arith.constant 0 : i32
    return %c0_i32, %c0_i32_0 : i32, i32
  }
  func.func @transform_6(%arg0: i32) -> (i32, i32) {
    %c0_i32 = arith.constant 0 : i32
    %c0_i32_0 = arith.constant 0 : i32
    return %arg0, %c0_i32 : i32, i32
  }
}

</mosaic_0001>

<bundles_post_ra>
// kernel: cnn_text_forward.1
= control target key start
LH: loop header
LB: loop body
LE: loop exit
PB: predicated region body
PF: predicated region fallthrough
CT: control target
= control target key end

     0   :  { %vm35_vm0 = vsmask.f32 3328  ;;  %vm36_vm1 = vsmask.f32 7440  ;;  %vm108_vm3 = vcmask 261120   ;;  %vm247_vm4 = vcmask 1042432   ;;  %s859_s0 = inlined_call_operand.vmem [shape: bf16[2,18,32], index: 0, kind: input, shape index: {}]   ;;  %s860_s1 = inlined_call_operand.vmem [shape: bf16[96,128], index: 1, kind: input, shape index: {}]   ;;  %s861_s2 = inlined_call_operand.vmem [shape: f32[1,128], index: 2, kind: input, shape index: {}]   ;;  %s862_s3 = inlined_call_operand.vmem [shape: s32[1,128], index: 3, kind: input, shape index: {}]   ;;  %s863_s4 = inlined_call_operand.vmem [shape: bf16[128,128], index: 4, kind: input, shape index: {}]   ;;  %s864_s5 = inlined_call_operand.vmem [shape: f32[1,128], index: 5, kind: input, shape index: {}]   ;;  %s865_s6 = inlined_call_operand.hbm [shape: f32[2,128], index: 6, kind: output, shape index: {}]  }
   0x1   :  { %v631_v0 = vld [vmem:[%s860_s1 + $0x10] sm:$0xff]   ;;  %v632_v1 = vld [vmem:[%s860_s1 + $0x18] sm:$0xff]   ;;  %v718_v2 = vld [vmem:[%s859_s0] sm:$0xf]  ;;  %v671_v44 = vmov 0.0   ;;  %vm248_vm5 = vcmask 1046532  }
   0x2   :  { %576 = vmatprep.subr.bf16.mxu0 %v631_v0  ;;  %v723_v3 = vld [vmem:[%s859_s0 + $0x4] sm:$0xf]  ;;  %v728_v4 = vld [vmem:[%s859_s0 + $0x8] sm:$0x1]  ;;  %v39_v5 = vshrl.u32 %v718_v2, 16  ;;  %v42_v6 = vshll.u32 %v718_v2, 16  ;;  %vm757_vm2 = vmor %vm35_vm0, %vm36_vm1  ;;  %600 = vmatprep.subr.bf16.mxu1 %v671_v44 }
   0x3   :  { %577 = vmatpush3.bf16.msra.mxu0 %v631_v0  ;;  %v48_v7 = vshll.u32 %v723_v3, 16  ;;  %v52_v8 = vshrl.u32 %v723_v3, 16  ;;  %v58_v9 = vshll.u32 %v728_v4, 16  ;;  %v633_v12 = vld [vmem:[%s860_s1] sm:$0xff]   ;;  %v741_v16 = vld [vmem:[%s859_s0 + $0xc] sm:$0xf]  ;;  %v530_v46 = vcombine.low %v718_v2, %v723_v3 }
   0x4   :  { %578 = vmatprep.subr.bf16.mxu0 %v632_v1  ;;  %v41_v10 = vrot.slane %v39_v5, 4  ;;  %v44_v11 = vrot.slane %v42_v6, 5  ;;  %v746_v18 = vld [vmem:[%s859_s0 + $0x10] sm:$0xf]  ;;  %v751_v19 = vld [vmem:[%s859_s0 + $0x14] sm:$0x1] }
   0x5   :  { %v50_v13 = vrot.slane %v48_v7, 5  ;;  %v54_v14 = vrot.slane %v52_v8, 4  ;;  %v60_v15 = vrot.slane %v58_v9, 5  ;;  %v63_v20 = vshrl.u32 %v741_v16, 16  ;;  %v639_v40 = vld [vmem:[%s863_s4] sm:$0xff]   ;;  %v634_v43 = vld [vmem:[%s860_s1 + $0x8] sm:$0xff]  }
   0x6   :  { %v45_v17 = vor.u32 %v44_v11, %v41_v10  ;;  %v66_v21 = vshll.u32 %v741_v16, 16  ;;  %v72_v24 = vshll.u32 %v746_v18, 16  ;;  %v76_v25 = vshrl.u32 %v746_v18, 16  ;;  %v241_v47 = vld [vmem:[%s859_s0] sm:$0xe]  ;;  %601 = vmatpush3.bf16.msra.mxu1 %v639_v40 }
   0x7   :  { %579 = vmatpush3.bf16.msra.mxu0 %v632_v1  ;;  %v55_v23 = vor.u32 %v54_v14, %v50_v13  ;;  %v82_v26 = vshll.u32 %v751_v19, 16  ;;  %v65_v28 = vrot.slane %v63_v20, 4  ;;  %v252_v48 = vrot.slane %v723_v3, 5  ;;  %602 = vmatprep.subr.bf16.mxu1 %v671_v44 }
   0x8   :  { %584 = vmatprep.subr.bf16.mxu0 %v633_v12  ;;  %v46_v27 = vrot.slane %v45_v17, 4  ;;  %v68_v29 = vrot.slane %v66_v21, 5  ;;  %v74_v31 = vrot.slane %v72_v24, 5  ;;  %v78_v32 = vrot.slane %v76_v25, 4 }
   0x9   :  { %v56_v30 = vrot.slane %v55_v23, 4  ;;  %v84_v37 = vrot.slane %v82_v26, 5 }
   0xa   :  { %v51_v33 = vsel %vm757_vm2, %v46_v27, %v50_v13  ;;  %v69_v34 = vor.u32 %v68_v29, %v65_v28  ;;  %v79_v36 = vor.u32 %v78_v32, %v74_v31 }
   0xb   :  { %v61_v35 = vsel %vm757_vm2, %v56_v30, %v60_v15 }
   0xc   :  { %v524_v38 = vcombine.low %v51_v33, %v61_v35  ;;  %v70_v39 = vrot.slane %v69_v34, 4  ;;  %v80_v41 = vrot.slane %v79_v36, 4 }
   0xe   :  { %580 = vmatprep.mubr.msk.bf16.mxu0 %vm108_vm3, %v524_v38  ;;  %v75_v42 = vsel %vm757_vm2, %v70_v39, %v74_v31  ;;  %v85_v45 = vsel %vm757_vm2, %v80_v41, %v84_v37 }
   0xf   :  { %v525_v49 = vcombine.low %v75_v42, %v85_v45 }
  0x11   :  { %581 = vmatmul.mubr.msk.bf16.vlgmr.msra.gmra.mrb[0].mxu0 %vm108_vm3, %v525_v49 }
  0x12   :  { %585 = vmatpush3.bf16.msra.mxu0 %v633_v12  ;;  %588 = vmatprep.mubr.msk.bf16.mxu0 %vm108_vm3, %v530_v46 }
  0x13   :  { %11 = vsyncpa [#allocation3], 0  ;;  %v255_v50 = vrot.slane %v728_v4, 5  ;;  %586 = vmatprep.subr.bf16.mxu0 %v634_v43  ;;  %v636_v51 = vld [vmem:[%s860_s1 + $0x20] sm:$0xff]   ;;  %v536_v52 = vrot.slane %v241_v47, 9  ;;  %v254_v53 = vrot.slane %v252_v48, 4  ;;  %v531_v57 = vcombine.low %v741_v16, %v746_v18 }
  0x14   :  { %vm792_vm6 = vmor %vm247_vm4, %vm248_vm5  ;;  %v259_v59 = vrot.slane %v746_v18, 5  ;;  %v638_v60 = vld [vmem:[%s860_s1 + $0x28] sm:$0xff]   ;;  %v262_v62 = vrot.slane %v751_v19, 5  ;;  %v641_v5 = vld [vmem:[%s863_s4 + $0x10] sm:$0xff]   ;;  %vm672_vm7 = vmmov 0   ;;  %v360_v11 = vlaneseq }
  0x15   :  { %v253_v55 = vsel %vm792_vm6, %v536_v52, %v252_v48  ;;  %v256_v56 = vsel %vm792_vm6, %v254_v53, %v255_v50  ;;  %v242_v61 = vld [vmem:[%s859_s0 + $0xc] sm:$0xe]  ;;  %v642_v6 = vld [vmem:[%s863_s4 + $0x18] sm:$0xff]   ;;  %v643_v7 = vld [vmem:[%s863_s4 + $0x20] sm:$0xff]   ;;  %616 = vmatprep.mubr.msk.bf16.mxu1 %vm672_vm7, %v671_v44  ;;  %vm417_vm10 = vcmask 1041409  }
  0x16   :  { %587 = vmatpush3.bf16.msra.mxu0 %v634_v43  ;;  %v538_v58 = vcombine.low %v253_v55, %v256_v56  ;;  %v537_v63 = vrot.slane %v242_v61, 9  ;;  %v261_v0 = vrot.slane %v259_v59, 4  ;;  %v640_v4 = vld [vmem:[%s863_s4 + $0x8] sm:$0xff]   ;;  %v645_v9 = vld [vmem:[%s863_s4 + $0x30] sm:$0xff]   ;;  %v646_v10 = vld [vmem:[%s863_s4 + $0x38] sm:$0xff]   ;;  %v361_v12 = vshrl.u32 %v360_v11, 7 }
  0x17   :  { %592 = vmatprep.subr.bf16.mxu0 %v636_v51  ;;  %603 = vmatpush3.bf16.msra.mxu1 %v640_v4  ;;  %v644_v8 = vld [vmem:[%s863_s4 + $0x28] sm:$0xff]   ;;  %v544_v13 = vld [vmem:[%s861_s2] ss:$0 sm:$0xff]  ;;  %s673_s4 = smov [#allocation2]  }
  0x18   :  { %v260_v1 = vsel %vm792_vm6, %v537_v63, %v259_v59  ;;  %v263_v2 = vsel %vm792_vm6, %v261_v0, %v262_v62  ;;  %604 = vmatprep.subr.bf16.mxu1 %v671_v44  ;;  %v362_v15 = vadd.s32 8, %v361_v12  ;;  %v545_v17 = vld [vmem:[%s862_s3] ss:$0 sm:$0xff]  ;;  %s516_s19 = sshll.u32 %s673_s4, 4  ;;  %s517_s19 = int_to_ptr.vmem [resolvable:$true] %s516_s19 }
  0x19   :  { %v539_v3 = vcombine.low %v260_v1, %v263_v2  ;;  %vm368_vm8 = vcmp.lt.s32.totalorder %v361_v12, %v545_v17  ;;  %v546_v52 = vld [vmem:[%s864_s5] ss:$0 sm:$0xff]  ;;  %s647_s20 = scalar_lea.vmem %s517_s19, 32  ;;  %p652_p1 = scmp.lt.s32.totalorder %s517_s19, %s517_s19 }
  0x1a   :  { %vm369_vm9 = vcmp.lt.s32.totalorder %v362_v15, %v545_v17  ;;  %p648_p0 = scmp.ne.s32.totalorder %s517_s19, %s647_s20  ;;  %p653_p2 = scmp.lt.s32.totalorder %s647_s20, %s647_s20 }
  0x1b   :  { %605 = vmatpush3.bf16.msra.mxu1 %v641_v5 }
  0x1c   :  { %606 = vmatprep.subr.bf16.mxu1 %v671_v44  ;;  %p654_p3 = por %p653_p2, %p652_p1 }
  0x1d   :  { %589 = vmatmul.mubr.msk.bf16.vlgmr.msra.gmra.mrb[0].mxu0 %vm108_vm3, %v531_v57 }
  0x1e   :  { %593 = vmatpush3.bf16.msra.mxu0 %v636_v51  ;;  %596 = vmatprep.mubr.msk.bf16.mxu0 %vm108_vm3, %v538_v58  ;;  %p655_p4 = pnand %p654_p3, %p648_p0 }
  0x1f   :  { %594 = vmatprep.subr.bf16.mxu0 %v638_v60  ;;  %607 = vmatpush3.bf16.msra.mxu1 %v642_v6 }
  0x20   :  { %608 = vmatprep.subr.bf16.mxu1 %v671_v44 }
  0x22   :  { %595 = vmatpush3.bf16.msra.mxu0 %v638_v60 }
  0x23   :  { %609 = vmatpush3.bf16.msra.mxu1 %v643_v7 }
  0x24   :  { %610 = vmatprep.subr.bf16.mxu1 %v671_v44 }
  0x27   :  { %611 = vmatpush3.bf16.msra.mxu1 %v644_v8 }
  0x28   :  { %612 = vmatprep.subr.bf16.mxu1 %v671_v44 }
  0x29   :  { %597 = vmatmul.mubr.msk.bf16.vlgmr.msra.gmra.mrb[0].mxu0 %vm108_vm3, %v539_v3 }
  0x2b   :  { %613 = vmatpush3.bf16.msra.mxu1 %v645_v9 }
  0x2c   :  { %614 = vmatprep.subr.bf16.mxu1 %v671_v44 }
  0x2f   :  { %615 = vmatpush3.bf16.msra.mxu1 %v646_v10 }
  0xfc   :  { %v598_v14 = vpop.f32.mrb[0].mxu0 }
  0xfd   :  { %v354_v16 = vadd.f32 %v598_v14, %v544_v13  ;;  %v326_v18 = vpop.f32.mrb[1].mxu0 }
  0xfe   :  { %v352_v19 = vadd.f32 %v544_v13, %v326_v18  ;;  %v599_v20 = vpop.f32.mrb[2].mxu0 }
  0xff   :  { %v358_v21 = vmax.f32 %v354_v16, 0.0  ;;  %v355_v22 = vadd.f32 %v599_v20, %v544_v13  ;;  %v329_v23 = vpop.f32.mrb[3].mxu0 }
 0x100   :  { %v356_v24 = vmax.f32 %v352_v19, 0.0  ;;  %v353_v25 = vadd.f32 %v544_v13, %v329_v23 }
 0x101   :  { %v359_v26 = vmax.f32 %v355_v22, 0.0  ;;  %v372_v28 = vsel %vm368_vm8, %v358_v21, 0.0 }
 0x102   :  { %v357_v27 = vmax.f32 %v353_v25, 0.0  ;;  %v370_v30 = vsel %vm368_vm8, %v356_v24, 0.0 }
 0x103   :  { %v373_v29 = vsel %vm369_vm9, %v359_v26, 0.0 }
 0x104   :  { %v381_v31 = vmax.f32 %v372_v28, %v373_v29  ;;  %v371_v32 = vsel %vm369_vm9, %v357_v27, 0.0 }
 0x105   :  { %v374_v33 = vmax.f32 %v370_v30, %v371_v32 }
 0x106   :  { %v382_v34 = vrot.slane %v381_v31, 4 }
 0x107   :  { %v375_v35 = vrot.slane %v374_v33, 4 }
 0x108   :  { %v383_v36 = vmax.f32 %v381_v31, %v382_v34 }
 0x109   :  { %v376_v37 = vmax.f32 %v374_v33, %v375_v35 }
 0x10a   :  { %v384_v38 = vrot.slane %v383_v36, 2 }
 0x10b   :  { %v377_v39 = vrot.slane %v376_v37, 2 }
 0x10c   :  { %v385_v40 = vmax.f32 %v383_v36, %v384_v38 }
 0x10d   :  { %v378_v41 = vmax.f32 %v376_v37, %v377_v39 }
 0x10e   :  { %v386_v42 = vrot.slane %v385_v40, 1 }
 0x10f   :  { %v379_v43 = vrot.slane %v378_v41, 1 }
 0x110   :  { %v387_v44 = vmax.f32 %v385_v40, %v386_v42 }
 0x111   :  { %v380_v45 = vmax.f32 %v378_v41, %v379_v43 }
 0x112   :  { %v389_v46 = vpack.c.bf16 %v387_v44, %v387_v44 }
 0x113   :  { %v388_v47 = vpack.c.bf16 %v380_v45, %v380_v45 }
 0x114   :  { %v416_v48 = vunpack.c.l.b16 %v389_v46 }
 0x115   :  { %v415_v49 = vunpack.c.l.b16 %v388_v47 }
 0x117   :  { %v418_v50 = vsel %vm417_vm10, %v416_v48, %v415_v49 }
 0x118   :  { %v419_v51 = vpack.c.b16 %v418_v50, %v418_v50 }
 0x11a   :  { %617 = vmatmul.mubr.bf16.vlgmr.msra.gmra.mrb[0].mxu1 %v419_v51 }
 0x1ed   :  { %v503_v53 = vpop.f32.mrb[0].mxu1 }
 0x1ee   :  { %v504_v54 = vadd.f32 %v546_v52, %v503_v53  ;;  %v618_v55 = vpop.f32.mrb[1].mxu1 }
 0x1ef   :  { %v506_v56 = vpop.f32.mrb[2].mxu1 }
 0x1f0   :  { %509 = vst [vmem:[#allocation2] sm:$0x3] %v504_v54  ;;  %v619_v57 = vpop.f32.mrb[3].mxu1 }
 0x1f1   :  { %658 = shalt.err (!%p655_p4)
}
 0x1f2   :  { %s659_s5 = scalar_lea.hbm %s865_s6, 32 }
 0x1f3   :  { %p660_p5 = scmp.ne.s32.totalorder %s865_s6, %s659_s5  ;;  %p663_p6 = scmp.lt.u32.totalorder %s659_s5, %s865_s6 }
 0x1f5   :  { %p665_p7 = pnand %p663_p6, %p660_p5 }
 0x1f7   :  { %668 = shalt.err (!%p665_p7)
}
 0x1f8   :  { %519 = dma.vmem_to_hbm [thread:$0]  %s517_s19, 32, %s865_s6, [#allocation3]  }
 0x1f9   :  { %669 = dma.done.wait [#allocation3], 32  }
 0x1fa   :  { %670 = vsyncadd [#allocation3], 4294967264 }
 0x1fb   :  { %523 = vsyncpa [#allocation3], 1 }

</bundles_post_ra>
